<compile_context>
chip_gen: v6e
topology: v6e:2x2x1
jax: 0.10.0
libtpu: 0.0.40
codegen_flags: <defaults>
</compile_context>

<pallas_src>
import functools
import jax
import jax.numpy as jnp
from jax import lax
from jax.experimental import pallas as pl
from jax.experimental.pallas import tpu as pltpu


def _choose_seq_tile(S):
    """Largest multiple-of-8 tile (<=256) that divides S; falls back to S itself."""
    for t in (256, 128, 64, 32, 16, 8):
        if S % t == 0:
            return t
    return S


def _embeddings_kernel(ids_ref, word_hbm, pos_ref, out_ref, gbuf, sem, *, vocab_size):
    # ids_ref : SMEM (B, S) int32      -- scalar-prefetched token ids (addressing only)
    # word_hbm: HBM  (V, D)            -- full word-embedding table, never staged into VMEM
    # pos_ref : VMEM (TILE_S, D)       -- position rows for this sequence tile
    # out_ref : VMEM (TILE_S, D)       -- output tile (batch dim squeezed away)
    # gbuf    : VMEM (TILE_S, D)       -- scratch: gathered word-embedding rows
    # sem     : DMA semaphore shared by the equal-sized row copies
    b = pl.program_id(0)
    st = pl.program_id(1)
    tile = out_ref.shape[0]
    base = st * tile

    def issue(i, carry):
        tok = ids_ref[b, base + i]
        # Clamp out-of-range ids so a bad id can never trigger an OOB HBM DMA.
        # (PyTorch nn.Embedding would raise instead; valid inputs are unaffected.)
        tok = jnp.clip(tok, 0, vocab_size - 1)
        pltpu.make_async_copy(
            word_hbm.at[pl.ds(tok, 1)], gbuf.at[pl.ds(i, 1)], sem
        ).start()
        return carry

    def drain(i, carry):
        # Dummy src slice of identical shape just sizes the wait.
        pltpu.make_async_copy(
            word_hbm.at[pl.ds(0, 1)], gbuf.at[pl.ds(i, 1)], sem
        ).wait()
        return carry

    lax.fori_loop(0, tile, issue, 0)   # fire all row gathers for this tile
    lax.fori_loop(0, tile, drain, 0)   # wait for all of them

    # Fused position-embedding add (free VPU filler under the DMA-bound gather).
    out_ref[...] = (gbuf[...] + pos_ref[...]).astype(out_ref.dtype)
    # TODO(synk): training-mode dropout (pltpu.prng_seed + prng_random_bits + inverted
    # scaling); forward here matches eval mode where nn.Dropout is the identity.


def embeddings_forward(input_ids, word_table, pos_table):
    """input_ids: (B, S) int32; word_table: (V, D); pos_table: (max_seq_len, D)."""
    B, S = input_ids.shape
    V, D = word_table.shape
    assert pos_table.shape[0] >= S and pos_table.shape[1] == D

    tile_s = _choose_seq_tile(S)
    if S % 8 != 0:
        # Small / odd S: make the pos block equal to the full (sliced) array dims so the
        # (8,128) block constraint is satisfied.  Negligible copy.
        pos_table = pos_table[:S]
    grid = (B, S // tile_s)

    kernel = functools.partial(_embeddings_kernel, vocab_size=V)

    return pl.pallas_call(
        kernel,
        out_shape=jax.ShapeDtypeStruct((B, S, D), word_table.dtype),
        grid_spec=pltpu.PrefetchScalarGridSpec(
            num_scalar_prefetch=1,           # input_ids -> SMEM, passed to index_maps
            grid=grid,
            in_specs=[
                pl.BlockSpec(memory_space=pl.ANY),                       # word table in HBM
                pl.BlockSpec((tile_s, D), lambda b, st, ids: (st, 0)),   # pos rows for tile
            ],
            out_specs=pl.BlockSpec((None, tile_s, D),
                                   lambda b, st, ids: (b, st, 0)),
            scratch_shapes=[
                pltpu.VMEM((tile_s, D), word_table.dtype),  # gathered rows
                pltpu.SemaphoreType.DMA,                    # shared row-copy semaphore
            ],
        ),
        compiler_params=pltpu.CompilerParams(
            dimension_semantics=("parallel", "parallel")),
    )(input_ids, word_table, pos_table)


if __name__ == "__main__":
    # Small config consistent with the module's __init__.
    config = {
        "vocab_size": 512,
        "max_seq_len": 16,
        "embedding_dim": 32,
        "transformer_dim": 32,
        "dropout_prob": 0.1,
    }
    B, S = 2, 8
    V, D = config["vocab_size"], config["embedding_dim"]

    key = jax.random.PRNGKey(0)
    k_ids, k_word, k_pos = jax.random.split(key, 3)

    # Deterministic parameter init: normal(std=0.02), matching torch.nn.init.normal_.
    word_table = (0.02 * jax.random.normal(k_word, (V, D))).astype(jnp.float32)
    pos_table = (0.02 * jax.random.normal(k_pos, (config["max_seq_len"], D))).astype(jnp.float32)

    input_ids = jax.random.randint(k_ids, (B, S), 0, V, dtype=jnp.int32)

    out = embeddings_forward(input_ids, word_table, pos_table)
    out = jax.block_until_ready(out)

    # Pure-JAX reference (eval-mode forward): word_emb[ids] + pos_emb[0:S].
    ref = word_table[input_ids] + pos_table[:S][None, :, :]
    assert out.shape == (B, S, D)
    assert jnp.allclose(out, ref, atol=1e-6, rtol=1e-6), "mismatch vs reference"

    print("KERNEL_OK")
</pallas_src>

<mosaic_0001>
module attributes {stable_mosaic.version = 11 : i64} {
  func.func @_embeddings_kernel(%arg0: i32, %arg1: i32, %arg2: memref<2x8xi32, #tpu.memory_space<smem>>, %arg3: memref<512x32xf32, #tpu.memory_space<any>>, %arg4: memref<8x32xf32, #tpu.memory_space<vmem>>, %arg5: memref<1x8x32xf32, #tpu.memory_space<vmem>>, %arg6: memref<8x32xf32, #tpu.memory_space<vmem>>, %arg7: memref<!tpu.dma_semaphore, #tpu.memory_space<semaphore_mem>>) attributes {dimension_semantics = [#tpu.dimension_semantics<parallel>, #tpu.dimension_semantics<parallel>], iteration_bounds = array<i64: 2, 1>, scalar_prefetch = 1 : i64, scratch_operands = 2 : i64, tpu.core_type = #tpu.core_type<tc>, window_params = [{}, {transform_indices = @transform_1, window_bounds = array<i64: 8, 32>}, {transform_indices = @transform_2, window_bounds = array<i64: 1, 8, 32>}]} {
    %c8_i32 = arith.constant 8 : i32
    %0 = arith.muli %arg1, %c8_i32 : i32
    %c0_i32 = arith.constant 0 : i32
    %c8_i32_0 = arith.constant 8 : i32
    %1 = arith.addi %c0_i32, %c8_i32_0 : i32
    %c1_i32 = arith.constant 1 : i32
    scf.for %arg8 = %c0_i32 to %1 step %c1_i32  : i32 {
      %9 = arith.addi %0, %arg8 : i32
      %10 = arith.index_cast %arg0 : i32 to index
      %11 = arith.index_cast %9 : i32 to index
      %12 = memref.load %arg2[%10, %11] : memref<2x8xi32, #tpu.memory_space<smem>>
      %c0_i32_12 = arith.constant 0 : i32
      %c511_i32 = arith.constant 511 : i32
      %13 = arith.maxsi %c0_i32_12, %12 : i32
      %14 = arith.minsi %c511_i32, %13 : i32
      %c0_i32_13 = arith.constant 0 : i32
      %15 = tpu.memref_slice %arg3[%14, %c0_i32_13] : memref<512x32xf32, #tpu.memory_space<any>> -> memref<1x32xf32, #tpu.memory_space<any>>
      %c0_i32_14 = arith.constant 0 : i32
      %16 = tpu.memref_slice %arg6[%arg8, %c0_i32_14] : memref<8x32xf32, #tpu.memory_space<vmem>> -> memref<1x32xf32, #tpu.memory_space<vmem>>
      tpu.enqueue_dma source(%15 : memref<1x32xf32, #tpu.memory_space<any>>) target(%16 : memref<1x32xf32, #tpu.memory_space<vmem>>) target_semaphore(%arg7 : memref<!tpu.dma_semaphore, #tpu.memory_space<semaphore_mem>>)
    }
    %c8_i32_1 = arith.constant 8 : i32
    %c0_i32_2 = arith.constant 0 : i32
    %c8_i32_3 = arith.constant 8 : i32
    %2 = arith.addi %c0_i32_2, %c8_i32_3 : i32
    %c1_i32_4 = arith.constant 1 : i32
    scf.for %arg8 = %c0_i32_2 to %2 step %c1_i32_4  : i32 {
      %c0_i32_12 = arith.constant 0 : i32
      %c0_i32_13 = arith.constant 0 : i32
      %9 = tpu.memref_slice %arg3[%c0_i32_12, %c0_i32_13] : memref<512x32xf32, #tpu.memory_space<any>> -> memref<1x32xf32, #tpu.memory_space<any>>
      %c0_i32_14 = arith.constant 0 : i32
      %10 = tpu.memref_slice %arg6[%arg8, %c0_i32_14] : memref<8x32xf32, #tpu.memory_space<vmem>> -> memref<1x32xf32, #tpu.memory_space<vmem>>
      tpu.wait_dma2 semaphore(%arg7 : memref<!tpu.dma_semaphore, #tpu.memory_space<semaphore_mem>>) src(%9 : memref<1x32xf32, #tpu.memory_space<any>>) dst(%10 : memref<1x32xf32, #tpu.memory_space<vmem>>)
    }
    %c8_i32_5 = arith.constant 8 : i32
    %c0 = arith.constant 0 : index
    %c0_6 = arith.constant 0 : index
    %3 = vector.load %arg6[%c0, %c0_6] : memref<8x32xf32, #tpu.memory_space<vmem>>, vector<8x32xf32>
    %c0_7 = arith.constant 0 : index
    %c0_8 = arith.constant 0 : index
    %4 = vector.load %arg4[%c0_7, %c0_8] : memref<8x32xf32, #tpu.memory_space<vmem>>, vector<8x32xf32>
    %5 = arith.addf %3, %4 : vector<8x32xf32>
    %c0_9 = arith.constant 0 : index
    %c0_10 = arith.constant 0 : index
    %c0_11 = arith.constant 0 : index
    %6 = vector.load %arg5[%c0_9, %c0_10, %c0_11] : memref<1x8x32xf32, #tpu.memory_space<vmem>>, vector<1x8x32xf32>
    %7 = vector.shape_cast %6 : vector<1x8x32xf32> to vector<8x32xf32>
    %8 = vector.shape_cast %5 : vector<8x32xf32> to vector<1x8x32xf32>
    tpu.vector_store %arg5[%c0_9, %c0_10, %c0_11], %8 {strides = array<i32>} : memref<1x8x32xf32, #tpu.memory_space<vmem>>, vector<1x8x32xf32>,
    return
  }
  func.func @transform_1(%arg0: i32, %arg1: i32, %arg2: memref<2x8xi32, #tpu.memory_space<smem>>) -> (i32, i32) {
    %c0_i32 = arith.constant 0 : i32
    %c0_i32_0 = arith.constant 0 : i32
    return %arg1, %c0_i32 : i32, i32
  }
  func.func @transform_2(%arg0: i32, %arg1: i32, %arg2: memref<2x8xi32, #tpu.memory_space<smem>>) -> (i32, i32, i32) {
    %c0_i32 = arith.constant 0 : i32
    %c0_i32_0 = arith.constant 0 : i32
    return %arg0, %arg1, %c0_i32 : i32, i32, i32
  }
}

</mosaic_0001>

<bundles_post_ra>
// kernel: tpu_custom_call.1
= control target key start
LH: loop header
LB: loop body
LE: loop exit
PB: predicated region body
PF: predicated region fallthrough
CT: control target
= control target key end

     0   :  { %s674_s0 = inlined_call_operand.vmem [shape: s32[2,8], index: 0, kind: input, shape index: {}]   ;;  %s675_s1 = inlined_call_operand.vmem [shape: f32[512,32], index: 1, kind: input, shape index: {}]   ;;  %s676_s2 = inlined_call_operand.vmem [shape: f32[16,32], index: 2, kind: input, shape index: {}]   ;;  %s677_s3 = inlined_call_operand.hbm [shape: f32[2,8,32], index: 3, kind: output, shape index: {}]  }
   0x1   :  { %s8_s14 = sshll.u32 %s674_s0, 4  ;;  %s9_s14 = int_to_ptr.vmem [resolvable:$true] %s8_s14 }
   0x2   :  { %s421_s15 = scalar_lea.vmem %s9_s14, 32  ;;  %p426_p1 = scmp.lt.s32.totalorder %s9_s14, %s9_s14 }
   0x3   :  { %p422_p0 = scmp.ne.s32.totalorder %s9_s14, %s421_s15  ;;  %p427_p2 = scmp.lt.s32.totalorder %s421_s15, %s421_s15 }
   0x5   :  { %p428_p3 = por %p427_p2, %p426_p1 }
   0x7   :  { %p429_p4 = pnand %p428_p3, %p422_p0 }
   0x9   :  { %432 = shalt.err (!%p429_p4)  }
   0xa   :  { %s531_s16 = smov [#allocation5]  }
   0xb   :  { %11 = dma.vmem_to_smem %s9_s14, 32, %s531_s16, [#allocation4] }
   0xc   :  { %491 = dma.done.wait [#allocation4], 32 }
   0xd   :  { %492 = vsyncadd [#allocation4], 4294967264 }
   0xe   :  { %13 = sfence }
   0xf   :  { %14 = vsyncpa [#allocation7], 0 }
  0x10   :  { %16 = vsyncpa [#allocation7 + $0x1], 0  ;;  %s556_s17 = smov 0   ;;  %s558_s18 = smov 0  }
  0x11   :  { %s560_s0 = smov 0   ;;  %s562_s19 = smov 0  }
  0x12   :  { %s564_s20 = smov 0   ;;  %s566_s21 = smov 0  }
  0x13 LB: > { %s330_s22 = sadd.s32 4294967295, %s521_s21   ;;  %s331_s23 = sadd.s32 4294967294, %s521_s21   ;;  %s521_s21 = sphi %s566_s21, %s22_s21   ;;  %s517_s20 = sphi %s564_s20, %s684_s20   ;;  %s513_s19 = sphi %s562_s19, %s683_s19   ;;  %s509_s0 = sphi %s560_s0, %s682_s0   ;;  %s505_s18 = sphi %s558_s18, %s681_s18   ;;  %s501_s17 = sphi %s556_s17, %s680_s17  }
  0x14   : > { %s34_s24 = sadd.s32 1, %s517_s20  ;;  %s69_s25 = sadd.s32 1, %s509_s0 }
  0x15   : > { %p36_p5 = scmp.ge.s32.totalorder %s34_s24, 2  ;;  %p79_p6 = scmp.ne.s32.totalorder %s509_s0, %s505_s18 }
  0x16   : > { %p80_p7 = scmp.eq.s32.totalorder %s330_s22, 1  ;;  %p85_p8 = scmp.ne.s32.totalorder %s505_s18, %s501_s17 }
  0x17   : > { %s686_s24 = smov (%p36_p5, %s34_s24), 0  ;;  %p86_p10 = scmp.eq.s32.totalorder %s331_s23, 1 }
  0x18   : > { %p596_p9 = por %p80_p7, %p79_p6  ;;  %s64_s27 = ssub.s32 %s517_s20, %s686_s24 }
  0x19   : > { %p334_p11 = scmp.ge.s32.totalorder %s521_s21, 1  ;;  %p67_p12 = scmp.eq.s32.totalorder %s64_s27, 0 }
  0x1a   : > { %p603_p13 = por %p86_p10, %p85_p8  ;;  %p111_p0 = scmp.lt.s32.totalorder %s521_s21, 3 }
  0x1b   : > { %s609_s29 = scalar_select %p67_p12, %s509_s0, %s69_s25  }
  0x1c   : > { %p112_p1 = pnand %p334_p11, %p111_p0 }
  0x1d   : > { %s127_s30 = sand.u32 (!%p112_p1), 1, %s505_s18   ;;  %s523_s6 = smov (!%p112_p1), 0  }
  0x1e   : > { %115 = sbr.rel (%p112_p1) target bundleno = 87 (0x57), region = 24  ;;  %s614_s4 = sshll.u32 (!%p112_p1), %s127_s30, 3 }
  0x1f   : > { %s129_s5 = scalar_lea.vmem (!%p112_p1), [#allocation6], %s614_s4 }
  0x23 LB: >> { %s142_s7 = sshra.s32 %s525_s6, 7  ;;  %s147_s8 = sand.u32 127, %s525_s6  ;;  %s525_s6 = sphi %s523_s6, %s140_s6  }
  0x24   : >> { %s144_s9 = sadd.s32 %s513_s19, %s142_s7  ;;  %s155_s16 = scalar_lea.vmem [#allocation2], %s525_s6 }
  0x25   : >> { %s336_s10 = sshll.u32 %s144_s9, 7 }
  0x26   : >> { %s148_s11 = sadd.s32 %s336_s10, %s147_s8 }
  0x27   : >> { %s149_s12 = sld [smem:[#allocation5 + %s148_s11]] }
  0x2d   : >> { %p150_p2 = scmp.gt.s32.totalorder %s149_s12, 0  ;;  %p337_p3 = scmp.lt.s32.totalorder %s149_s12, 511 }
  0x2f   : >> { %s688_s12 = smov (!%p150_p2, %s149_s12), 0 }
  0x30   : >> { %s690_s12 = smov (!%p337_p3, %s688_s12), 511 }
  0x31   : >> { %s154_s15 = scalar_lea.vmem %s675_s1, %s690_s12 }
  0x32   : >> { %v174_v0 = vld [vmem:[%s154_s15] sm:$0x1] }
  0x33   : >> { %175 = vst [vmem:[%s155_s16] sm:$0x1] %v174_v0 }
  0x34   : >> { %201 = vsyncadd [#allocation3], 16  ;;  %s140_s6 = sadd.s32 1, %s525_s6  }
  0x35   : >> { %p137_p4 = scmp.ge.s32.totalorder %s140_s6, 8  }
  0x36   : > { %s527_s22 = smov (%p137_p4), 0  }
  0x37   : > { %139 = sbr.rel (!%p137_p4) target bundleno = 35 (0x23), region = 115 }
  0x3c LB: >> { %493 = dma.done.wait [#allocation3], 16  ;;  %s529_s22 = sphi %s527_s22, %s207_s22  }
  0x3d   : >> { %494 = vsyncadd [#allocation3], 4294967280  ;;  %s207_s22 = sadd.s32 1, %s529_s22  }
  0x3e   : >> { %p204_p5 = scmp.ge.s32.totalorder %s207_s22, 8  }
  0x3f   : > { %v211_v1 = vld [vmem:[#allocation2] sm:$0xff] (%p204_p5)  ;;  %vm214_vm0 = vcmask (%p204_p5), 261120   ;;  %s343_s27 = sshll.u32 (%p204_p5), %s513_s19, 7  ;;  %s231_s9 = sshll.u32 (%p204_p5), %s129_s5, 4  ;;  %s232_s9 = int_to_ptr.vmem [resolvable:$true] %s231_s9 }
  0x40   : > { %206 = sbr.rel (!%p204_p5) target bundleno = 60 (0x3c), region = 126  ;;  %v212_v2 = vld [vmem:[%s676_s2] sm:$0xff] (%p204_p5)  ;;  %s628_s8 = scalar_lea.hbm (%p204_p5), %s677_s3, %s343_s27 }
  0x41   : > { %v213_v3 = vadd.f32 (%p204_p5), %v212_v2, %v211_v1  ;;  %s217_s10 = scalar_lea.sflag (%p204_p5), [#allocation7], %s127_s30  ;;  %s433_s11 = scalar_lea.vmem (%p204_p5), %s232_s9, 128 }
  0x42   : > { %p434_p6 = scmp.ne.s32.totalorder (%p204_p5), %s232_s9, %s433_s11  ;;  %s532_s12 = smov (%p204_p5), [#allocation6]  }
  0x43   : > { %215 = vst.msk [vmem:[%s129_s5] sm:$0xff] (%p204_p5), %vm214_vm0, %v213_v3  ;;  %s437_s19 = sshll.u32 (%p204_p5), %s532_s12, 4  ;;  %s438_s19 = int_to_ptr.vmem [resolvable:$false] %s437_s19 }
  0x44   : > { %p435_p7 = pnand (%p204_p5), %p434_p6, %p596_p9  ;;  %s439_s13 = scalar_lea.vmem (%p204_p5), %s438_s19, 256 }
  0x45   : > { %p440_p10 = scmp.lt.s32.totalorder %s232_s9, %s438_s19  ;;  %p441_p11 = scmp.lt.s32.totalorder %s439_s13, %s433_s11 }
  0x46   : > { %p436_p8 = pneg %p435_p7 }
  0x47   : > { %p442_p12 = por %p441_p11, %p440_p10 }
  0x49   : > { %p443_p0 = pnand %p442_p12, %p436_p8 }
  0x4b   : > { %446 = shalt.err (!%p443_p0)
}
  0x4c   : > { %s447_s4 = scalar_lea.hbm %s628_s8, 128  ;;  %s451_s14 = scalar_lea.hbm %s677_s3, 256 }
  0x4d   : > { %p448_p1 = scmp.ne.s32.totalorder %s628_s8, %s447_s4  ;;  %p452_p4 = scmp.lt.s32.totalorder %s628_s8, %s677_s3 }
  0x4e   : > { %p453_p5 = scmp.lt.s32.totalorder %s451_s14, %s447_s4 }
  0x4f   : > { %p449_p2 = pnand %p448_p1, %p596_p9 }
  0x50   : > { %p454_p6 = por %p453_p5, %p452_p4 }
  0x51   : > { %p450_p3 = pneg %p449_p2 }
  0x53   : > { %p455_p7 = pnand %p454_p6, %p450_p3 }
  0x55   : > { %458 = shalt.err (!%p455_p7)
}
  0x56   : > { %349 = dma.vmem_to_hbm [thread:$0]  (%p596_p9), %s232_s9, 128, %s628_s8, %s217_s10  }
  0x57 PF: > { %p355_p8 = scmp.ge.s32.totalorder %s521_s21, 2  ;;  %s243_s22 = sand.u32 1, %s501_s17  }
  0x58   : > { %s244_s23 = scalar_lea.sflag [#allocation7], %s243_s22 }
  0x59   : > { %p352_p10 = pnand %p355_p8, %p603_p13 }
  0x5b   : > { %p353_p11 = pneg %p352_p10 }
  0x5d   : > { %496 = dma.done.wait (%p353_p11), %s244_s23, 128  }
  0x5e   : > { %498 = vsyncadd (%p353_p11), %s244_s23, 4294967168  ;;  %s22_s21 = sadd.s32 1, %s521_s21   ;;  %s680_s17 = smov %s505_s18 }
  0x5f   : > { %p19_p12 = scmp.ge.s32.totalorder %s22_s21, 4   ;;  %s681_s18 = smov %s509_s0 }
  0x60   : > { %s682_s0 = smov %s609_s29  ;;  %s683_s19 = smov %s517_s20 }
  0x61   : > { %s684_s20 = smov %s686_s24  ;;  %21 = sbr.rel (!%p19_p12) target bundleno = 19 (0x13), region = 137 }
  0x66   :  { %249 = vsyncpa [#allocation7], 1 }
  0x67   :  { %251 = vsyncpa [#allocation7 + $0x1], 1 }
  0x68   :  { %252 = vsyncmov [#allocation3] }
  0x6b   :  { %s253_s26 = vpop.sfrf %252 }
  0x6c   :  { %p346_p9 = scmp.ne.s32.totalorder %s253_s26, 0 }
  0x6e   :  { %257 = shalt.err (%p346_p9)  }

</bundles_post_ra>
